<compile_context>
chip_gen: v7x
topology: tpu7x:2x2x1
jax: 0.10.0
libtpu: 0.0.40
codegen_flags: <defaults>
</compile_context>

<pallas_src>
import jax
import jax.numpy as jnp
from jax.experimental import pallas as pl
from jax.experimental.pallas import tpu as pltpu


def _pos_emb_copy_kernel(emb_ref, out_ref):
    """Copy rows [i*blk_seq, (i+1)*blk_seq) of the table to the output tile.

    emb_ref: (blk_seq, d_model) VMEM tile of the embedding table
    out_ref: (blk_seq, d_model) VMEM tile of the output
    """
    out_ref[...] = emb_ref[...]


def _choose_blk_seq(seq_length, d_model, itemsize):
    """Pick a seq-tile size: multiple of 8, ~<=2 MiB per buffer."""
    target_bytes = 2 * 1024 * 1024  # per buffer; x4 buffers stays << 32 MiB VMEM
    rows = max(8, target_bytes // max(1, d_model * itemsize))
    blk = min(rows, seq_length)
    blk = ((blk + 7) // 8) * 8  # (8, 128) block-shape rule on the sublane dim
    return blk


def positional_embedding(x, emb_table):
    """Pallas equivalent of PositionalEmbedding.forward.

    x: (batch, seq) array — only x.shape[1] is used (like torch x.size(1)).
    emb_table: (max_seq_length, d_model) float32 embedding weights.
    returns: (1, seq, d_model) with emb_table's dtype (float32).
    """
    seq_length = x.shape[1]
    max_seq_length, d_model = emb_table.shape
    assert seq_length <= max_seq_length

    blk_seq = _choose_blk_seq(seq_length, d_model, emb_table.dtype.itemsize)
    grid = (pl.cdiv(seq_length, blk_seq),)

    out = pl.pallas_call(
        _pos_emb_copy_kernel,
        out_shape=jax.ShapeDtypeStruct((seq_length, d_model), emb_table.dtype),
        grid=grid,
        in_specs=[
            # Only the rows this output block needs — same block index as out.
            pl.BlockSpec((blk_seq, d_model), lambda i: (i, 0)),
        ],
        out_specs=pl.BlockSpec((blk_seq, d_model), lambda i: (i, 0)),
        compiler_params=pltpu.CompilerParams(
            dimension_semantics=("parallel",)),
    )(emb_table)

    # torch: position_ids.unsqueeze(0) -> leading batch dim of 1
    return out[None, :, :]


if __name__ == "__main__":
    # Small, module-consistent shapes.
    batch = 2
    seq = 8
    max_seq_length = 16
    d_model = 32

    key = jax.random.PRNGKey(0)
    k_emb, k_x = jax.random.split(key)

    # nn.Embedding default init: N(0, 1)
    emb_table = jax.random.normal(k_emb, (max_seq_length, d_model),
                                  dtype=jnp.float32)
    # x: token ids (batch, seq); only its seq axis matters
    x = jax.random.randint(k_x, (batch, seq), 0, max_seq_length,
                           dtype=jnp.int32)

    out = positional_embedding(x, emb_table)
    out = jax.block_until_ready(out)

    # Reference check: embedding(arange(seq)) == table[:seq]
    ref = emb_table[:seq][None, :, :]
    assert out.shape == (1, seq, d_model), out.shape
    assert out.dtype == jnp.float32
    assert jnp.allclose(out, ref, atol=1e-6), "mismatch vs reference"

    print("KERNEL_OK")
</pallas_src>

<mosaic_0001>
module attributes {stable_mosaic.version = 11 : i64} {
  func.func @_pos_emb_copy_kernel(%arg0: i32, %arg1: memref<8x32xf32, #tpu.memory_space<vmem>>, %arg2: memref<8x32xf32, #tpu.memory_space<vmem>>) attributes {dimension_semantics = [#tpu.dimension_semantics<parallel>], iteration_bounds = array<i64: 1>, scalar_prefetch = 0 : i64, scratch_operands = 0 : i64, tpu.core_type = #tpu.core_type<tc>, window_params = [{transform_indices = @transform_0, window_bounds = array<i64: 8, 32>}, {transform_indices = @transform_1, window_bounds = array<i64: 8, 32>}]} {
    %c0 = arith.constant 0 : index
    %c0_0 = arith.constant 0 : index
    %0 = vector.load %arg1[%c0, %c0_0] : memref<8x32xf32, #tpu.memory_space<vmem>>, vector<8x32xf32>
    %c0_1 = arith.constant 0 : index
    %c0_2 = arith.constant 0 : index
    %1 = vector.load %arg2[%c0_1, %c0_2] : memref<8x32xf32, #tpu.memory_space<vmem>>, vector<8x32xf32>
    tpu.vector_store %arg2[%c0_1, %c0_2], %0 {strides = array<i32>} : memref<8x32xf32, #tpu.memory_space<vmem>>, vector<8x32xf32>,
    return
  }
  func.func @transform_0(%arg0: i32) -> (i32, i32) {
    %c0_i32 = arith.constant 0 : i32
    %c0_i32_0 = arith.constant 0 : i32
    return %arg0, %c0_i32 : i32, i32
  }
  func.func @transform_1(%arg0: i32) -> (i32, i32) {
    %c0_i32 = arith.constant 0 : i32
    %c0_i32_0 = arith.constant 0 : i32
    return %arg0, %c0_i32 : i32, i32
  }
}

</mosaic_0001>

<bundles_post_ra>
// kernel: tpu_custom_call.1
= control target key start
LH: loop header
LB: loop body
LE: loop exit
PB: predicated region body
PF: predicated region fallthrough
CT: control target
= control target key end

     0   :  { %6 = vsyncpa [#allocation3], 0  ;;  %s128_s0 = inlined_call_operand.hbm [shape: f32[16,32], index: 0, kind: input, shape index: {}]   ;;  %s129_s1 = inlined_call_operand.hbm [shape: f32[8,32], index: 1, kind: output, shape index: {}]  }
   0x1   :  { %7 = vsyncpa [#allocation4], 0  ;;  %s89_s6 = smov [#allocation2]   ;;  %s41_s10 = scalar_lea.hbm %s128_s0, 128 }
   0x2   :  { %s14_s7 = sshll.u32 %s89_s6, 4  ;;  %p42_p0 = scmp.ne.s32.totalorder %s128_s0, %s41_s10  ;;  %s15_s7 = int_to_ptr.vmem [resolvable:$true] %s14_s7 }
   0x3   :  { %s43_s15 = scalar_lea.hbm %s128_s0, 256  ;;  %p45_p2 = scmp.lt.u32.totalorder %s41_s10, %s128_s0 }
   0x4   :  { %p44_p1 = scmp.lt.u32.totalorder %s43_s15, %s41_s10 }
   0x6   :  { %p46_p3 = por %p45_p2, %p44_p1 }
   0x8   :  { %p47_p4 = pnand %p46_p3, %p42_p0 }
   0xa   :  { %50 = shalt.err (!%p47_p4)
}
   0xb   :  { %s51_s18 = scalar_lea.vmem %s15_s7, 128  ;;  %p56_p6 = scmp.lt.s32.totalorder %s15_s7, %s15_s7 }
   0xc   :  { %p52_p5 = scmp.ne.s32.totalorder %s15_s7, %s51_s18  ;;  %p57_p7 = scmp.lt.s32.totalorder %s51_s18, %s51_s18 }
   0xe   :  { %p58_p8 = por %p57_p7, %p56_p6 }
  0x10   :  { %p59_p9 = pnand %p58_p8, %p52_p5 }
  0x12   :  { %62 = shalt.err (!%p59_p9)
}
  0x13   :  { %17 = dma.hbm_to_vmem [thread:$0]  %s128_s0, 128, %s15_s7, [#allocation3]  }
  0x14   :  { %85 = dma.done.wait [#allocation3], 128  }
  0x15   :  { %86 = vsyncadd [#allocation3], 4294967168  ;;  %s90_s21 = smov [#allocation5]   ;;  %vm22_vm0 = vcmask 261120   ;;  %v21_v0 = vld [vmem:[#allocation2] sm:$0xff] }
  0x16   :  { %s30_s22 = sshll.u32 %s90_s21, 4  ;;  %23 = vst.msk [vmem:[#allocation5] sm:$0xff] %vm22_vm0, %v21_v0  ;;  %s31_s22 = int_to_ptr.vmem [resolvable:$true] %s30_s22 }
  0x17   :  { %s63_s23 = scalar_lea.vmem %s31_s22, 128  ;;  %p68_p11 = scmp.lt.s32.totalorder %s31_s22, %s31_s22 }
  0x18   :  { %p64_p10 = scmp.ne.s32.totalorder %s31_s22, %s63_s23  ;;  %p69_p12 = scmp.lt.s32.totalorder %s63_s23, %s63_s23 }
  0x1a   :  { %p70_p13 = por %p69_p12, %p68_p11 }
  0x1c   :  { %p71_p0 = pnand %p70_p13, %p64_p10 }
  0x1e   :  { %74 = shalt.err (!%p71_p0)
}
  0x1f   :  { %s75_s26 = scalar_lea.hbm %s129_s1, 128 }
  0x20   :  { %p76_p1 = scmp.ne.s32.totalorder %s129_s1, %s75_s26  ;;  %p79_p2 = scmp.lt.u32.totalorder %s75_s26, %s129_s1 }
  0x22   :  { %p81_p3 = pnand %p79_p2, %p76_p1 }
  0x24   :  { %84 = shalt.err (!%p81_p3)
}
  0x25   :  { %33 = dma.vmem_to_hbm [thread:$0]  %s31_s22, 128, %s129_s1, [#allocation4]  }
  0x26   :  { %87 = dma.done.wait [#allocation4], 128  }
  0x27   :  { %88 = vsyncadd [#allocation4], 4294967168 }
  0x28   :  { %37 = vsyncpa [#allocation3], 1 }
  0x29   :  { %38 = vsyncpa [#allocation4], 1 }

</bundles_post_ra>
